<compile_context>
chip_gen: v6e
topology: v6e:2x2x1
jax: 0.10.0
libtpu: 0.0.40
codegen_flags: <defaults>
</compile_context>

<pallas_src>
import functools

import jax
import jax.numpy as jnp
from jax.experimental import pallas as pl
from jax.experimental.pallas import tpu as pltpu


def _attention_core(q_ref, k_ref, v_ref, scale):
    # q_ref: (bhc, Lq, Dk), k_ref: (bhc, Lk, Dk), v_ref: (bhc, Lk, Dv)
    # bf16 operands (MXU-native on v5e/v6e/v7x) with f32 accumulation; the MXU
    # absorbs the k transpose by contracting over k's last dim.
    q = q_ref[...].astype(jnp.bfloat16)
    k = k_ref[...].astype(jnp.bfloat16)
    s = jnp.einsum("bqd,bkd->bqk", q, k, preferred_element_type=jnp.float32)
    s = s * scale                                # full-precision scale on the small tensor
    # numerically stable softmax along the key axis, in f32
    m = jnp.max(s, axis=-1, keepdims=True)
    p = jnp.exp(s - m)
    l = jnp.sum(p, axis=-1, keepdims=True)
    w = p * pl.reciprocal(l, approx=True)        # EUP reciprocal instead of a VALU divide
    # TODO(synk): attn_dropout (p=0.0) is identity at eval; prev / masks are None here.
    o = jnp.einsum("bqk,bkd->bqd", w.astype(jnp.bfloat16),
                   v_ref[...].astype(jnp.bfloat16),
                   preferred_element_type=jnp.float32)
    return o, w


def _sdpa_kernel(q_ref, k_ref, v_ref, out_ref, attn_ref, *, scale):
    o, w = _attention_core(q_ref, k_ref, v_ref, scale)
    # Head-major output blocks: single dense store per output, no per-head loop.
    out_ref[...] = o.astype(out_ref.dtype)
    attn_ref[...] = w.astype(attn_ref.dtype)


def _sdpa_kernel_no_attn(q_ref, k_ref, v_ref, out_ref, *, scale):
    o, _ = _attention_core(q_ref, k_ref, v_ref, scale)
    out_ref[...] = o.astype(out_ref.dtype)


def _grid_config(bh):
    """Chip-dependent grid: 1 step on single-TC chips (v5e/v6e); a CORE_PARALLEL
    2-way split only on v7x (2 TensorCores/chip)."""
    kind = ""
    try:
        kind = jax.devices()[0].device_kind.lower()
    except Exception:
        pass
    if "v7" in kind and bh % 2 == 0:
        core_parallel = getattr(pltpu, "CORE_PARALLEL", "parallel")
        return 2, (core_parallel,)
    return 1, ("arbitrary",)


def scaled_dot_product_attention(q, k, v, scale, *, return_attn_weights=True):
    """Scaled dot-product attention (matches the PyTorch ScaledDotProductAttention).

    q: [B, H, Lq, Dk], k: [B, H, Lk, Dk] (un-transposed, lane-dense layout),
    v: [B, H, Lk, Dv], scale: python scalar.

    The math equals the module's `matmul(q, k_t) * scale` where k_t is k transposed
    to [B, H, Dk, Lk]; a caller holding k_t can pass jnp.swapaxes(k_t, -1, -2).

    Returns (output [B,H,Lq,Dv], attn_weights [B,H,Lq,Lk]) or just output.
    """
    B, H, Lq, Dk = q.shape
    Lk = k.shape[2]
    Dv = v.shape[-1]
    BH = B * H

    nblk, semantics = _grid_config(BH)
    bhc = BH // nblk

    qf = q.reshape(BH, Lq, Dk)
    kf = k.reshape(BH, Lk, Dk)
    vf = v.reshape(BH, Lk, Dv)

    # scale is static in this module (lsa=False => non-learnable parameter).
    # TODO(synk): if lsa=True (learnable scale), pass it as an SMEM scalar input instead.
    scale = float(scale)

    in_specs = [
        pl.BlockSpec((bhc, Lq, Dk), lambda i: (i, 0, 0)),
        pl.BlockSpec((bhc, Lk, Dk), lambda i: (i, 0, 0)),
        pl.BlockSpec((bhc, Lk, Dv), lambda i: (i, 0, 0)),
    ]
    # Head-major outputs: wrapper reshape to (B, H, Lq, *) is a free contiguous view.
    out_spec = pl.BlockSpec((None, bhc, Lq, Dv), lambda i: (i, 0, 0, 0))
    attn_spec = pl.BlockSpec((None, bhc, Lq, Lk), lambda i: (i, 0, 0, 0))
    compiler_params = pltpu.CompilerParams(dimension_semantics=semantics)

    itemsize = jnp.dtype(q.dtype).itemsize
    flops = 2 * BH * Lq * Lk * (Dk + Dv)
    transcendentals = BH * Lq * (Lk + 1)      # exp + approx reciprocal
    bytes_in = (qf.size + kf.size + vf.size) * itemsize
    bytes_out = BH * Lq * Dv * itemsize
    bytes_attn = BH * Lq * Lk * itemsize

    # TODO(synk): for production sequence lengths, replace the full (Lq, Lk) score block
    # with an Lk-tiled online-softmax (flash) path; size the tile against
    # pltpu.get_tpu_info().vmem_capacity_bytes (v7x has 64 MiB VMEM, not 128 MiB)
    # and set vmem_limit_bytes explicitly.

    if return_attn_weights:
        out_hm, attn_hm = pl.pallas_call(
            functools.partial(_sdpa_kernel, scale=scale),
            out_shape=(
                jax.ShapeDtypeStruct((nblk, bhc, Lq, Dv), q.dtype),
                jax.ShapeDtypeStruct((nblk, bhc, Lq, Lk), q.dtype),
            ),
            grid_spec=pltpu.PrefetchScalarGridSpec(
                num_scalar_prefetch=0,
                grid=(nblk,),
                in_specs=in_specs,
                out_specs=[out_spec, attn_spec],
            ),
            compiler_params=compiler_params,
            cost_estimate=pl.CostEstimate(
                flops=flops,
                transcendentals=transcendentals,
                bytes_accessed=bytes_in + bytes_out + bytes_attn,
            ),
        )(qf, kf, vf)
        out = out_hm.reshape(B, H, Lq, Dv)
        attn = attn_hm.reshape(B, H, Lq, Lk)
        return out, attn

    out_hm = pl.pallas_call(
        functools.partial(_sdpa_kernel_no_attn, scale=scale),
        out_shape=jax.ShapeDtypeStruct((nblk, bhc, Lq, Dv), q.dtype),
        grid_spec=pltpu.PrefetchScalarGridSpec(
            num_scalar_prefetch=0,
            grid=(nblk,),
            in_specs=in_specs,
            out_specs=out_spec,
        ),
        compiler_params=compiler_params,
        cost_estimate=pl.CostEstimate(
            flops=flops,
            transcendentals=transcendentals,
            bytes_accessed=bytes_in + bytes_out,
        ),
    )(qf, kf, vf)
    return out_hm.reshape(B, H, Lq, Dv)


if __name__ == "__main__":
    # Shapes consistent with period_attention: per (batch*nvar, head) slice,
    # Lq = Lk = period_len, Dk = Dv = period_num; head_dim = d_model = 32.
    B, H, Lq, Lk = 2, 4, 8, 8
    d_model = 32
    Dk = Dv = d_model

    key = jax.random.PRNGKey(0)
    kq, kk, kv = jax.random.split(key, 3)
    q = jax.random.normal(kq, (B, H, Lq, Dk), dtype=jnp.float32)
    k = jax.random.normal(kk, (B, H, Lk, Dk), dtype=jnp.float32)
    v = jax.random.normal(kv, (B, H, Lk, Dv), dtype=jnp.float32)

    # Deterministic parameter init: scale = head_dim ** -0.5 (nn.Parameter, requires_grad=False)
    scale = d_model ** (-0.5)

    out, attn = scaled_dot_product_attention(q, k, v, scale)
    out = jax.block_until_ready(out)
    attn = jax.block_until_ready(attn)

    # Variant without the attn_weights HBM writeback (DynoFormerLayer drops `att`).
    out_only = scaled_dot_product_attention(q, k, v, scale, return_attn_weights=False)
    out_only = jax.block_until_ready(out_only)

    # Pure-JAX f32 reference (k given un-transposed, so contract over its last dim).
    s_ref = jnp.einsum("bhqd,bhkd->bhqk", q, k) * scale
    w_ref = jax.nn.softmax(s_ref, axis=-1)
    o_ref = jnp.einsum("bhqk,bhkd->bhqd", w_ref, v)

    # Tolerance covers bf16 MXU operands (f32 accumulation) + the EUP approximate
    # reciprocal used in softmax normalization.
    assert jnp.allclose(attn, w_ref, atol=2e-2, rtol=2e-2), "attn mismatch"
    assert jnp.allclose(out, o_ref, atol=2e-2, rtol=2e-2), "out mismatch"
    assert jnp.allclose(out_only, o_ref, atol=2e-2, rtol=2e-2), "out (no-attn) mismatch"

    print("KERNEL_OK")
</pallas_src>

<mosaic_0001>
module attributes {stable_mosaic.version = 11 : i64} {
  func.func @_sdpa_kernel(%arg0: i32, %arg1: memref<8x8x32xf32, #tpu.memory_space<vmem>>, %arg2: memref<8x8x32xf32, #tpu.memory_space<vmem>>, %arg3: memref<8x8x32xf32, #tpu.memory_space<vmem>>, %arg4: memref<1x8x8x32xf32, #tpu.memory_space<vmem>>, %arg5: memref<1x8x8x8xf32, #tpu.memory_space<vmem>>) attributes {dimension_semantics = [#tpu.dimension_semantics<arbitrary>], iteration_bounds = array<i64: 1>, scalar_prefetch = 0 : i64, scratch_operands = 0 : i64, tpu.core_type = #tpu.core_type<tc>, window_params = [{transform_indices = @transform_0, window_bounds = array<i64: 8, 8, 32>}, {transform_indices = @transform_1, window_bounds = array<i64: 8, 8, 32>}, {transform_indices = @transform_2, window_bounds = array<i64: 8, 8, 32>}, {transform_indices = @transform_3, window_bounds = array<i64: 1, 8, 8, 32>}, {transform_indices = @transform_4, window_bounds = array<i64: 1, 8, 8, 8>}]} {
    %c0 = arith.constant 0 : index
    %c0_0 = arith.constant 0 : index
    %c0_1 = arith.constant 0 : index
    %0 = vector.load %arg1[%c0, %c0_0, %c0_1] : memref<8x8x32xf32, #tpu.memory_space<vmem>>, vector<8x8x32xf32>
    %1 = arith.truncf %0 : vector<8x8x32xf32> to vector<8x8x32xbf16>
    %c0_2 = arith.constant 0 : index
    %c0_3 = arith.constant 0 : index
    %c0_4 = arith.constant 0 : index
    %2 = vector.load %arg2[%c0_2, %c0_3, %c0_4] : memref<8x8x32xf32, #tpu.memory_space<vmem>>, vector<8x8x32xf32>
    %3 = arith.truncf %2 : vector<8x8x32xf32> to vector<8x8x32xbf16>
    "tpu.trace_start"() <{level = 10 : i32, message = "bqd,bkd->bqk"}> : () -> ()
    %cst = arith.constant dense<0.000000e+00> : vector<8x8x8xf32>
    %4 = tpu.matmul %1, %3, %cst {dimension_numbers = #tpu.dot_dimension_numbers<[2], [2], [1], [1], [0, 0, 0, 1, 1, 1], [0], [0]>} : vector<8x8x32xbf16>, vector<8x8x32xbf16>, vector<8x8x8xf32> -> vector<8x8x8xf32>
    "tpu.trace_stop"() : () -> ()
    %cst_5 = arith.constant 0.176776692 : f32
    %5 = vector.broadcast %cst_5 : f32 to vector<8x8x8xf32>
    %6 = arith.mulf %4, %5 : vector<8x8x8xf32>
    %cst_6 = arith.constant dense<0xFF800000> : vector<8x8xf32>
    %7 = vector.multi_reduction <maximumf>, %6, %cst_6 [2] : vector<8x8x8xf32> to vector<8x8xf32>
    %8 = vector.shape_cast %7 : vector<8x8xf32> to vector<8x8x1xf32>
    %9 = vector.broadcast %8 : vector<8x8x1xf32> to vector<8x8x8xf32>
    %10 = arith.subf %6, %9 : vector<8x8x8xf32>
    %11 = math.exp %10 : vector<8x8x8xf32>
    %cst_7 = arith.constant dense<0.000000e+00> : vector<8x8xf32>
    %12 = vector.multi_reduction <add>, %11, %cst_7 [2] : vector<8x8x8xf32> to vector<8x8xf32>
    %13 = vector.shape_cast %12 : vector<8x8xf32> to vector<8x8x1xf32>
    %14 = tpu.reciprocal %13 {approx = true} : vector<8x8x1xf32> -> vector<8x8x1xf32>
    %15 = vector.broadcast %14 : vector<8x8x1xf32> to vector<8x8x8xf32>
    %16 = arith.mulf %11, %15 : vector<8x8x8xf32>
    %17 = arith.truncf %16 : vector<8x8x8xf32> to vector<8x8x8xbf16>
    %c0_8 = arith.constant 0 : index
    %c0_9 = arith.constant 0 : index
    %c0_10 = arith.constant 0 : index
    %18 = vector.load %arg3[%c0_8, %c0_9, %c0_10] : memref<8x8x32xf32, #tpu.memory_space<vmem>>, vector<8x8x32xf32>
    %19 = arith.truncf %18 : vector<8x8x32xf32> to vector<8x8x32xbf16>
    "tpu.trace_start"() <{level = 10 : i32, message = "bqk,bkd->bqd"}> : () -> ()
    %cst_11 = arith.constant dense<0.000000e+00> : vector<8x8x32xf32>
    %20 = tpu.matmul %17, %19, %cst_11 {dimension_numbers = #tpu.dot_dimension_numbers<[2], [1], [1], [2], [0, 0, 0, 1, 1, 2], [0], [0]>} : vector<8x8x8xbf16>, vector<8x8x32xbf16>, vector<8x8x32xf32> -> vector<8x8x32xf32>
    "tpu.trace_stop"() : () -> ()
    %c0_12 = arith.constant 0 : index
    %c0_13 = arith.constant 0 : index
    %c0_14 = arith.constant 0 : index
    %c0_15 = arith.constant 0 : index
    %21 = vector.load %arg4[%c0_12, %c0_13, %c0_14, %c0_15] : memref<1x8x8x32xf32, #tpu.memory_space<vmem>>, vector<1x8x8x32xf32>
    %22 = vector.shape_cast %21 : vector<1x8x8x32xf32> to vector<8x8x32xf32>
    %23 = vector.shape_cast %20 : vector<8x8x32xf32> to vector<1x8x8x32xf32>
    tpu.vector_store %arg4[%c0_12, %c0_13, %c0_14, %c0_15], %23 {strides = array<i32>} : memref<1x8x8x32xf32, #tpu.memory_space<vmem>>, vector<1x8x8x32xf32>,
    %c0_16 = arith.constant 0 : index
    %c0_17 = arith.constant 0 : index
    %c0_18 = arith.constant 0 : index
    %c0_19 = arith.constant 0 : index
    %24 = vector.load %arg5[%c0_16, %c0_17, %c0_18, %c0_19] : memref<1x8x8x8xf32, #tpu.memory_space<vmem>>, vector<1x8x8x8xf32>
    %25 = vector.shape_cast %24 : vector<1x8x8x8xf32> to vector<8x8x8xf32>
    %26 = vector.shape_cast %16 : vector<8x8x8xf32> to vector<1x8x8x8xf32>
    tpu.vector_store %arg5[%c0_16, %c0_17, %c0_18, %c0_19], %26 {strides = array<i32>} : memref<1x8x8x8xf32, #tpu.memory_space<vmem>>, vector<1x8x8x8xf32>,
    return
  }
  func.func @transform_0(%arg0: i32) -> (i32, i32, i32) {
    %c0_i32 = arith.constant 0 : i32
    %c0_i32_0 = arith.constant 0 : i32
    %c0_i32_1 = arith.constant 0 : i32
    return %arg0, %c0_i32, %c0_i32_0 : i32, i32, i32
  }
  func.func @transform_1(%arg0: i32) -> (i32, i32, i32) {
    %c0_i32 = arith.constant 0 : i32
    %c0_i32_0 = arith.constant 0 : i32
    %c0_i32_1 = arith.constant 0 : i32
    return %arg0, %c0_i32, %c0_i32_0 : i32, i32, i32
  }
  func.func @transform_2(%arg0: i32) -> (i32, i32, i32) {
    %c0_i32 = arith.constant 0 : i32
    %c0_i32_0 = arith.constant 0 : i32
    %c0_i32_1 = arith.constant 0 : i32
    return %arg0, %c0_i32, %c0_i32_0 : i32, i32, i32
  }
  func.func @transform_3(%arg0: i32) -> (i32, i32, i32, i32) {
    %c0_i32 = arith.constant 0 : i32
    %c0_i32_0 = arith.constant 0 : i32
    %c0_i32_1 = arith.constant 0 : i32
    %c0_i32_2 = arith.constant 0 : i32
    return %arg0, %c0_i32, %c0_i32_0, %c0_i32_1 : i32, i32, i32, i32
  }
  func.func @transform_4(%arg0: i32) -> (i32, i32, i32, i32) {
    %c0_i32 = arith.constant 0 : i32
    %c0_i32_0 = arith.constant 0 : i32
    %c0_i32_1 = arith.constant 0 : i32
    %c0_i32_2 = arith.constant 0 : i32
    return %arg0, %c0_i32, %c0_i32_0, %c0_i32_1 : i32, i32, i32, i32
  }
}

</mosaic_0001>

<bundles_post_ra>
// kernel: tpu_custom_call.1
= control target key start
LH: loop header
LB: loop body
LE: loop exit
PB: predicated region body
PF: predicated region fallthrough
CT: control target
= control target key end

     0   :  { %10 = vsyncpa [#allocation3], 0  ;;  %s1498_s0 = inlined_call_operand.hbm [shape: f32[8,8,32], index: 0, kind: input, shape index: {}]   ;;  %s1499_s1 = inlined_call_operand.hbm [shape: f32[8,8,32], index: 1, kind: input, shape index: {}]   ;;  %s1500_s2 = inlined_call_operand.hbm [shape: f32[8,8,32], index: 2, kind: input, shape index: {}]   ;;  %s1501_s3 = inlined_call_operand.hbm [shape: f32[1,8,8,32], index: 3, kind: output, shape index: {0}]   ;;  %s1502_s4 = inlined_call_operand.hbm [shape: f32[1,8,8,8], index: 4, kind: output, shape index: {1}]  }
   0x1   :  { %11 = vsyncpa [#allocation6], 0 }
   0x2   :  { %12 = vsyncpa [#allocation4], 0 }
   0x3   :  { %13 = vsyncpa [#allocation10], 0  ;;  %s1294_s15 = smov [#allocation5]   ;;  %s1295_s17 = smov [#allocation2]  }
   0x4   :  { %s31_s16 = sshll.u32 %s1294_s15, 4  ;;  %s19_s18 = sshll.u32 %s1295_s17, 4  ;;  %s32_s16 = int_to_ptr.vmem [resolvable:$true] %s31_s16  ;;  %s20_s18 = int_to_ptr.vmem [resolvable:$true] %s19_s18 }
   0x5   :  { %s1194_s19 = scalar_lea.vmem %s32_s16, 1024  ;;  %p1199_p1 = scmp.lt.s32.totalorder %s32_s16, %s32_s16 }
   0x6   :  { %p1195_p0 = scmp.ne.s32.totalorder %s32_s16, %s1194_s19  ;;  %p1200_p2 = scmp.lt.s32.totalorder %s1194_s19, %s1194_s19 }
   0x8   :  { %p1201_p3 = por %p1200_p2, %p1199_p1 }
   0xa   :  { %p1202_p4 = pnand %p1201_p3, %p1195_p0 }
   0xc   :  { %1205 = shalt.err (!%p1202_p4)
}
   0xd   :  { %s1296_s20 = smov 128   ;;  %s1297_s21 = smov 8  }
   0xe   :  { %37 = dma.hbm_to_vmem [thread:$0]  %s1499_s1, 1024, %s32_s16, [#allocation6], %s1296_s20, %s1296_s20, %s1297_s21  }
   0xf   :  { %s1214_s24 = scalar_lea.vmem %s20_s18, 1024  ;;  %p1219_p6 = scmp.lt.s32.totalorder %s20_s18, %s20_s18 }
  0x10   :  { %p1215_p5 = scmp.ne.s32.totalorder %s20_s18, %s1214_s24  ;;  %p1220_p7 = scmp.lt.s32.totalorder %s1214_s24, %s1214_s24 }
  0x12   :  { %p1221_p8 = por %p1220_p7, %p1219_p6 }
  0x14   :  { %p1222_p9 = pnand %p1221_p8, %p1215_p5 }
  0x16   :  { %1225 = shalt.err (!%p1222_p9)
}
  0x17   :  { %25 = dma.hbm_to_vmem [thread:$0]  %s1498_s0, 1024, %s20_s18, [#allocation3], %s1296_s20, %s1296_s20, %s1297_s21  }
  0x18   :  { %s1298_s27 = smov [#allocation7]  }
  0x19   :  { %s43_s28 = sshll.u32 %s1298_s27, 4  ;;  %s44_s28 = int_to_ptr.vmem [resolvable:$true] %s43_s28 }
  0x1a   :  { %s1234_s29 = scalar_lea.vmem %s44_s28, 1024  ;;  %p1239_p11 = scmp.lt.s32.totalorder %s44_s28, %s44_s28 }
  0x1b   :  { %p1235_p10 = scmp.ne.s32.totalorder %s44_s28, %s1234_s29  ;;  %p1240_p12 = scmp.lt.s32.totalorder %s1234_s29, %s1234_s29 }
  0x1d   :  { %p1241_p13 = por %p1240_p12, %p1239_p11 }
  0x1f   :  { %p1242_p0 = pnand %p1241_p13, %p1235_p10 }
  0x21   :  { %1245 = shalt.err (!%p1242_p0)
}
  0x22   :  { %49 = dma.hbm_to_vmem [thread:$0]  %s1500_s2, 1024, %s44_s28, [#allocation6], %s1296_s20, %s1296_s20, %s1297_s21  }
  0x23   :  { %1286 = dma.done.wait [#allocation3], 1024  }
  0x24   :  { %1287 = vsyncadd [#allocation3], 4294966272 }
  0x25   :  { %1288 = dma.done.wait [#allocation6], 2048  }
  0x26   :  { %1289 = vsyncadd [#allocation6], 4294965248  ;;  %v1299_v0 = vmov 0.0   ;;  %vm1300_vm0 = vmmov 0   ;;  %v76_v1 = vld [vmem:[#allocation5] sm:$0xff]  ;;  %vm92_vm1 = vcmask 261120  }
  0x27   :  { %1049 = vmatprep.subr.bf16.mxu0 %v1299_v0  ;;  %1055 = vmatprep.subr.bf16.mxu1 %v1299_v0  ;;  %v77_v2 = vld [vmem:[#allocation5 + $0x8] sm:$0xff]  ;;  %v84_v3 = vpack.c.bf16 %v76_v1, %v76_v1  ;;  %v78_v5 = vld [vmem:[#allocation5 + $0x10] sm:$0xff]  ;;  %v79_v6 = vld [vmem:[#allocation5 + $0x18] sm:$0xff]  ;;  %vm469_vm2 = vcmask 64512   ;;  %vm585_vm3 = vcmask 1043456   ;;  %s1301_s0 = smov [#allocation9]  }
  0x28   :  { %1051 = vmatprep.mubr.msk.bf16.mxu0 %vm1300_vm0, %v1299_v0  ;;  %1057 = vmatprep.mubr.msk.bf16.mxu1 %vm1300_vm0, %v1299_v0  ;;  %v85_v4 = vpack.c.bf16 %v77_v2, %v77_v2  ;;  %v60_v9 = vld [vmem:[#allocation2] sm:$0xff]  ;;  %v61_v10 = vld [vmem:[#allocation2 + $0x8] sm:$0xff]  ;;  %v86_v11 = vpack.c.bf16 %v78_v5, %v78_v5  ;;  %v87_v12 = vpack.c.bf16 %v79_v6, %v79_v6  ;;  %v62_v19 = vld [vmem:[#allocation2 + $0x10] sm:$0xff]  ;;  %s984_s2 = sshll.u32 %s1301_s0, 4  ;;  %s985_s2 = int_to_ptr.vmem [resolvable:$true] %s984_s2 }
  0x29   :  { %v97_v7 = vsel %vm92_vm1, %v84_v3, 0  ;;  %v68_v13 = vpack.c.bf16 %v60_v9, %v60_v9  ;;  %v69_v14 = vpack.c.bf16 %v61_v10, %v61_v10  ;;  %v80_v17 = vld [vmem:[#allocation5 + $0x20] sm:$0xff]  ;;  %v81_v18 = vld [vmem:[#allocation5 + $0x28] sm:$0xff]  ;;  %v63_v20 = vld [vmem:[#allocation2 + $0x18] sm:$0xff]  ;;  %v70_v23 = vpack.c.bf16 %v62_v19, %v62_v19  ;;  %s1246_s5 = scalar_lea.vmem %s985_s2, 1024  ;;  %p1251_p2 = scmp.lt.s32.totalorder %s985_s2, %s985_s2 }
  0x2a   :  { %v143_v8 = vsel %vm92_vm1, %v85_v4, 0  ;;  %1050 = vmatpush3.bf16.xpose.msra.mxu0 %v97_v7  ;;  %v189_v15 = vsel %vm92_vm1, %v86_v11, 0  ;;  %v235_v16 = vsel %vm92_vm1, %v87_v12, 0  ;;  %v88_v21 = vpack.c.bf16 %v80_v17, %v80_v17  ;;  %v82_v27 = vld [vmem:[#allocation5 + $0x30] sm:$0xff]  ;;  %v83_v28 = vld [vmem:[#allocation5 + $0x38] sm:$0xff]  ;;  %v64_v29 = vld [vmem:[#allocation2 + $0x20] sm:$0xff]  ;;  %p1247_p1 = scmp.ne.s32.totalorder %s985_s2, %s1246_s5  ;;  %p1252_p3 = scmp.lt.s32.totalorder %s1246_s5, %s1246_s5 }
  0x2b   :  { %1056 = vmatpush3.bf16.xpose.msra.mxu1 %v143_v8  ;;  %1061 = vmatprep.subr.bf16.mxu0 %v1299_v0  ;;  %v89_v22 = vpack.c.bf16 %v81_v18, %v81_v18  ;;  %v71_v24 = vpack.c.bf16 %v63_v20, %v63_v20  ;;  %v65_v30 = vld [vmem:[#allocation2 + $0x28] sm:$0xff]  ;;  %v90_v31 = vpack.c.bf16 %v82_v27, %v82_v27  ;;  %v66_v37 = vld [vmem:[#allocation2 + $0x30] sm:$0xff]  ;;  %v67_v38 = vld [vmem:[#allocation2 + $0x38] sm:$0xff] }
  0x2c   :  { %1067 = vmatprep.subr.bf16.mxu1 %v1299_v0  ;;  %v281_v25 = vsel %vm92_vm1, %v88_v21, 0  ;;  %v91_v32 = vpack.c.bf16 %v83_v28, %v83_v28  ;;  %v72_v33 = vpack.c.bf16 %v64_v29, %v64_v29  ;;  %v73_v34 = vpack.c.bf16 %v65_v30, %v65_v30  ;;  %p1253_p4 = por %p1252_p3, %p1251_p2 }
  0x2d   :  { %v327_v26 = vsel %vm92_vm1, %v89_v22, 0  ;;  %v373_v35 = vsel %vm92_vm1, %v90_v31, 0  ;;  %v74_v39 = vpack.c.bf16 %v66_v37, %v66_v37  ;;  %v75_v40 = vpack.c.bf16 %v67_v38, %v67_v38 }
  0x2e   :  { %v419_v36 = vsel %vm92_vm1, %v91_v32, 0  ;;  %p1254_p5 = pnand %p1253_p4, %p1247_p1 }
  0x31   :  { %1052 = vmatmul.mubr.msk.bf16.vlgmr.msra.gmra.mxu0 %vm92_vm1, %v68_v13 }
  0x32   :  { %1058 = vmatmul.mubr.msk.bf16.vlgmr.msra.gmra.mxu1 %vm92_vm1, %v69_v14  ;;  %1062 = vmatpush3.bf16.xpose.msra.mxu0 %v189_v15 }
  0x33   :  { %1068 = vmatpush3.bf16.xpose.msra.mxu1 %v235_v16  ;;  %1063 = vmatprep.mubr.msk.bf16.mxu0 %vm1300_vm0, %v1299_v0 }
  0x34   :  { %1069 = vmatprep.mubr.msk.bf16.mxu1 %vm1300_vm0, %v1299_v0  ;;  %1073 = vmatprep.subr.bf16.mxu0 %v1299_v0 }
  0x35   :  { %1079 = vmatprep.subr.bf16.mxu1 %v1299_v0 }
  0x39   :  { %1064 = vmatmul.mubr.msk.bf16.vlgmr.msra.gmra.mxu0 %vm92_vm1, %v70_v23 }
  0x3a   :  { %1070 = vmatmul.mubr.msk.bf16.vlgmr.msra.gmra.mxu1 %vm92_vm1, %v71_v24  ;;  %1074 = vmatpush3.bf16.xpose.msra.mxu0 %v281_v25 }
  0x3b   :  { %1080 = vmatpush3.bf16.xpose.msra.mxu1 %v327_v26  ;;  %1075 = vmatprep.mubr.msk.bf16.mxu0 %vm1300_vm0, %v1299_v0 }
  0x3c   :  { %1081 = vmatprep.mubr.msk.bf16.mxu1 %vm1300_vm0, %v1299_v0  ;;  %1085 = vmatprep.subr.bf16.mxu0 %v1299_v0 }
  0x3d   :  { %1091 = vmatprep.subr.bf16.mxu1 %v1299_v0 }
  0x41   :  { %1076 = vmatmul.mubr.msk.bf16.vlgmr.msra.gmra.mxu0 %vm92_vm1, %v72_v33 }
  0x42   :  { %1082 = vmatmul.mubr.msk.bf16.vlgmr.msra.gmra.mxu1 %vm92_vm1, %v73_v34  ;;  %1086 = vmatpush3.bf16.xpose.msra.mxu0 %v373_v35 }
  0x43   :  { %1092 = vmatpush3.bf16.xpose.msra.mxu1 %v419_v36  ;;  %1087 = vmatprep.mubr.msk.bf16.mxu0 %vm1300_vm0, %v1299_v0 }
  0x44   :  { %1093 = vmatprep.mubr.msk.bf16.mxu1 %vm1300_vm0, %v1299_v0  ;;  %1097 = vmatprep.subr.bf16.mxu0 %v1299_v0 }
  0x45   :  { %1103 = vmatprep.subr.bf16.mxu1 %v1299_v0 }
  0x49   :  { %1088 = vmatmul.mubr.msk.bf16.vlgmr.msra.gmra.mxu0 %vm92_vm1, %v74_v39 }
  0x4a   :  { %1094 = vmatmul.mubr.msk.bf16.vlgmr.msra.gmra.mxu1 %vm92_vm1, %v75_v40  ;;  %1099 = vmatprep.mubr.msk.bf16.mxu0 %vm1300_vm0, %v1299_v0 }
  0x4b   :  { %1105 = vmatprep.mubr.msk.bf16.mxu1 %vm1300_vm0, %v1299_v0 }
  0xf1   :  { %v133_v41 = vpop.f32.mrf.mxu0 }
  0xf2   :  { %v179_v42 = vpop.f32.mrf.mxu1  ;;  %v461_v43 = vmul.f32 0.17677669, %v133_v41 }
  0xf3   :  { %v462_v44 = vmul.f32 0.17677669, %v179_v42  ;;  %v1053_v45 = vpop.f32.mrf.mxu0 }
  0xf4   :  { %v1059_v46 = vpop.f32.mrf.mxu1  ;;  %v470_v47 = vsel %vm469_vm2, %v461_v43, -inf }
  0xf5   :  { %471 = vmax.xlane.f32.xlu0 %v470_v47  ;;  %v136_v49 = vpop.f32.mrf.mxu0  ;;  %v473_v50 = vsel %vm469_vm2, %v462_v44, -inf }
  0xf6   :  { %v182_v48 = vpop.f32.mrf.mxu1 }
  0xf7   :  { %v1054_v51 = vpop.f32.mrf.mxu0 }
  0xf8   :  { %v1060_v52 = vpop.f32.mrf.mxu1 }
  0xf9   :  { %474 = vmax.xlane.f32.xlu0 %v473_v50  ;;  %v225_v54 = vpop.f32.mrf.mxu0 }
  0xfa   :  { %v271_v53 = vpop.f32.mrf.mxu1  ;;  %v463_v56 = vmul.f32 0.17677669, %v225_v54 }
  0xfb   :  { %v464_v55 = vmul.f32 0.17677669, %v271_v53  ;;  %v1065_v57 = vpop.f32.mrf.mxu0 }
  0xfc   :  { %v1071_v58 = vpop.f32.mrf.mxu1  ;;  %v476_v59 = vsel %vm469_vm2, %v463_v56, -inf }
  0xfd   :  { %477 = vmax.xlane.f32.xlu1 %v476_v59  ;;  %v228_v61 = vpop.f32.mrf.mxu0  ;;  %v479_v62 = vsel %vm469_vm2, %v464_v55, -inf }
  0xfe   :  { %v274_v60 = vpop.f32.mrf.mxu1 }
  0xff   :  { %v1066_v63 = vpop.f32.mrf.mxu0 }
 0x100   :  { %v1072_v1 = vpop.f32.mrf.mxu1  ;;  %v566_v63 = vld [vmem:[#allocation7] sm:$0xff] }
 0x101   :  { %480 = vmax.xlane.f32.xlu1 %v479_v62  ;;  %v317_v3 = vpop.f32.mrf.mxu0  ;;  %v567_v1 = vld [vmem:[#allocation7 + $0x8] sm:$0xff] }
 0x102   :  { %v363_v2 = vpop.f32.mrf.mxu1  ;;  %v465_v5 = vmul.f32 0.17677669, %v317_v3 }
 0x103   :  { %v466_v4 = vmul.f32 0.17677669, %v363_v2  ;;  %v1077_v6 = vpop.f32.mrf.mxu0 }
 0x104   :  { %v1083_v7 = vpop.f32.mrf.mxu1  ;;  %v482_v9 = vsel %vm469_vm2, %v465_v5, -inf }
 0x105   :  { %v485_v8 = vsel %vm469_vm2, %v466_v4, -inf  ;;  %483 = vmax.xlane.f32.xlu0 %v482_v9  ;;  %v320_v11 = vpop.f32.mrf.mxu0 }
 0x106   :  { %v366_v10 = vpop.f32.mrf.mxu1  ;;  %486 = vmax.xlane.f32.xlu1 %v485_v8 }
 0x107   :  { %v1078_v12 = vpop.f32.mrf.mxu0 }
 0x108   :  { %v1084_v13 = vpop.f32.mrf.mxu1  ;;  %v568_v12 = vld [vmem:[#allocation7 + $0x10] sm:$0xff] }
 0x109   :  { %v409_v14 = vpop.f32.mrf.mxu0 }
 0x10a   :  { %v455_v15 = vpop.f32.mrf.mxu1  ;;  %v467_v16 = vmul.f32 0.17677669, %v409_v14  ;;  %v576_v14 = vpack.c.bf16 %v568_v12, %v568_v12 }
 0x10b   :  { %v468_v17 = vmul.f32 0.17677669, %v455_v15  ;;  %v1089_v18 = vpop.f32.mrf.mxu0 }
 0x10c   :  { %v1095_v19 = vpop.f32.mrf.mxu1  ;;  %v488_v21 = vsel %vm469_vm2, %v467_v16, -inf }
 0x10d   :  { %v491_v20 = vsel %vm469_vm2, %v468_v17, -inf  ;;  %489 = vmax.xlane.f32.xlu0 %v488_v21  ;;  %v412_v23 = vpop.f32.mrf.mxu0 }
 0x10e   :  { %v458_v22 = vpop.f32.mrf.mxu1  ;;  %492 = vmax.xlane.f32.xlu1 %v491_v20 }
 0x10f   :  { %v1090_v24 = vpop.f32.mrf.mxu0  ;;  %v679_v22 = vsel %vm585_vm3, %v576_v14, 0 }
 0x110   :  { %v1096_v25 = vpop.f32.mrf.mxu1  ;;  %v570_v24 = vld [vmem:[#allocation7 + $0x20] sm:$0xff] }
 0x17e   :  { %v472_v26 = vpop.xlane.xlu0 %471 }
 0x17f   :  { %v494_v27 = vsub.f32 %v461_v43, %v472_v26 }
 0x181   :  { %v502_v28 = vmul.f32 1.442695, %v494_v27 }
 0x182   :  { %v475_v29 = vpop.xlane.xlu0 %474 }
 0x183   :  { %1154 = vpow2.f32 %v502_v28  ;;  %v495_v30 = vsub.f32 %v462_v44, %v475_v29  ;;  %v578_v28 = vpack.c.bf16 %v570_v24, %v570_v24 }
 0x185   :  { %v504_v31 = vmul.f32 1.442695, %v495_v30  ;;  %v571_v30 = vld [vmem:[#allocation7 + $0x28] sm:$0xff] }
 0x186   :  { %v478_v32 = vpop.xlane.xlu1 %477 }
 0x187   :  { %1156 = vpow2.f32 %v504_v31  ;;  %v496_v33 = vsub.f32 %v463_v56, %v478_v32 }
 0x189   :  { %v506_v34 = vmul.f32 1.442695, %v496_v33 }
 0x18a   :  { %v481_v35 = vpop.xlane.xlu1 %480 }
 0x18b   :  { %1158 = vpow2.f32 %v506_v34  ;;  %v497_v36 = vsub.f32 %v464_v55, %v481_v35  ;;  %v771_v35 = vsel %vm585_vm3, %v578_v28, 0 }
 0x18d   :  { %v508_v37 = vmul.f32 1.442695, %v497_v36  ;;  %v579_v36 = vpack.c.bf16 %v571_v30, %v571_v30 }
 0x18e   :  { %v484_v39 = vpop.xlane.xlu0 %483 }
 0x18f   :  { %v487_v38 = vpop.xlane.xlu1 %486  ;;  %1160 = vpow2.f32 %v508_v37  ;;  %v498_v41 = vsub.f32 %v465_v5, %v484_v39  ;;  %v575_v5 = vpack.c.bf16 %v567_v1, %v567_v1  ;;  %v572_v39 = vld [vmem:[#allocation7 + $0x30] sm:$0xff] }
 0x190   :  { %v499_v40 = vsub.f32 %v466_v4, %v487_v38  ;;  %v1155_v42 = vpop.eup %1154  ;;  %v574_v4 = vpack.c.bf16 %v566_v63, %v566_v63 }
 0x191   :  { %v510_v45 = vmul.f32 1.442695, %v498_v41  ;;  %v518_v46 = vsel %vm469_vm2, %v1155_v42, 0.0  ;;  %v633_v8 = vsel %vm585_vm3, %v575_v5, 0  ;;  %v817_v41 = vsel %vm585_vm3, %v579_v36, 0 }
 0x192   :  { %v512_v43 = vmul.f32 1.442695, %v499_v40  ;;  %519 = vadd.xlane.f32.xlu0 %v518_v46  ;;  %v587_v7 = vsel %vm585_vm3, %v574_v4, 0  ;;  %1104 = vmatpush3.bf16.msra.mxu1 %v633_v8 }
 0x193   :  { %1098 = vmatpush3.bf16.msra.mxu0 %v587_v7  ;;  %1115 = vmatprep.subr.bf16.mxu1 %v1299_v0 }
 0x194   :  { %1162 = vpow2.f32 %v512_v43  ;;  %v1401_v44 = vpop.eup %1156  ;;  %1109 = vmatprep.subr.bf16.mxu0 %v1299_v0  ;;  %v580_v43 = vpack.c.bf16 %v572_v39, %v572_v39 }
 0x195   :  { %1164 = vpow2.f32 %v510_v45  ;;  %v521_v47 = vsel %vm469_vm2, %v1401_v44, 0.0  ;;  %v573_v45 = vld [vmem:[#allocation7 + $0x38] sm:$0xff] }
 0x196   :  { %522 = vadd.xlane.f32.xlu1 %v521_v47  ;;  %v490_v49 = vpop.xlane.xlu0 %489 }
 0x197   :  { %v493_v48 = vpop.xlane.xlu1 %492  ;;  %v500_v51 = vsub.f32 %v467_v16, %v490_v49  ;;  %v569_v16 = vld [vmem:[#allocation7 + $0x18] sm:$0xff] }
 0x198   :  { %v501_v50 = vsub.f32 %v468_v17, %v493_v48  ;;  %v1405_v52 = vpop.eup %1158  ;;  %v577_v21 = vpack.c.bf16 %v569_v16, %v569_v16  ;;  %v581_v48 = vpack.c.bf16 %v573_v45, %v573_v45 }
 0x199   :  { %v514_v54 = vmul.f32 1.442695, %v500_v51  ;;  %v524_v55 = vsel %vm469_vm2, %v1405_v52, 0.0 }
 0x19a   :  { %v516_v53 = vmul.f32 1.442695, %v501_v50  ;;  %525 = vadd.xlane.f32.xlu0 %v524_v55  ;;  %v725_v27 = vsel %vm585_vm3, %v577_v21, 0  ;;  %v863_v50 = vsel %vm585_vm3, %v580_v43, 0 }
 0x19c   :  { %1166 = vpow2.f32 %v516_v53  ;;  %v1409_v56 = vpop.eup %1160 }
 0x19d   :  { %1168 = vpow2.f32 %v514_v54  ;;  %v527_v57 = vsel %vm469_vm2, %v1409_v56, 0.0 }
 0x19e   :  { %528 = vadd.xlane.f32.xlu1 %v527_v57 }
 0x1a1   :  { %v1413_v58 = vpop.eup %1162 }
 0x1a2   :  { %v1415_v59 = vpop.eup %1164  ;;  %v533_v60 = vsel %vm469_vm2, %v1413_v58, 0.0 }
 0x1a3   :  { %534 = vadd.xlane.f32.xlu1 %v533_v60  ;;  %v530_v61 = vsel %vm469_vm2, %v1415_v59, 0.0 }
 0x1a4   :  { %531 = vadd.xlane.f32.xlu0 %v530_v61 }
 0x1a9   :  { %v1421_v62 = vpop.eup %1166 }
 0x1aa   :  { %v1423_v2 = vpop.eup %1168  ;;  %v539_v3 = vsel %vm469_vm2, %v1421_v62, 0.0 }
 0x1ab   :  { %540 = vadd.xlane.f32.xlu1 %v539_v3  ;;  %v536_v6 = vsel %vm469_vm2, %v1423_v2, 0.0 }
 0x1ac   :  { %537 = vadd.xlane.f32.xlu0 %v536_v6 }
 0x21b   :  { %v520_v9 = vpop.xlane.xlu0 %519 }
 0x21c   :  { %1170 = vrcp.f32 %v520_v9 }
 0x21f   :  { %v523_v10 = vpop.xlane.xlu1 %522 }
 0x220   :  { %1172 = vrcp.f32 %v523_v10 }
 0x223   :  { %v526_v11 = vpop.xlane.xlu0 %525 }
 0x224   :  { %1174 = vrcp.f32 %v526_v11 }
 0x227   :  { %v529_v13 = vpop.xlane.xlu1 %528 }
 0x228   :  { %1176 = vrcp.f32 %v529_v13 }
 0x229   :  { %v1171_v15 = vpop.eup %1170 }
 0x22a   :  { %v550_v17 = vmul.f32 %v1171_v15, %v1155_v42 }
 0x22c   :  { %v535_v18 = vpop.xlane.xlu1 %534  ;;  %v558_v20 = vpack.c.bf16 %v550_v17, %v550_v17  ;;  %959 = vst.msk [vmem:[#allocation9] sm:$0xff] %vm469_vm2, %v550_v17 }
 0x22d   :  { %1178 = vrcp.f32 %v535_v18  ;;  %v532_v19 = vpop.xlane.xlu0 %531  ;;  %v1173_v23 = vpop.eup %1172 }
 0x22e   :  { %1180 = vrcp.f32 %v532_v19  ;;  %1100 = vmatmul.mubr.msk.bf16.vlgmr.msra.gmra.mxu0 %vm469_vm2, %v558_v20  ;;  %v551_v25 = vmul.f32 %v1173_v23, %v1401_v44 }
 0x22f   :  { %1110 = vmatpush3.bf16.msra.mxu0 %v679_v22  ;;  %1111 = vmatprep.mubr.msk.bf16.mxu0 %vm1300_vm0, %v1299_v0 }
 0x230   :  { %v559_v26 = vpack.c.bf16 %v551_v25, %v551_v25  ;;  %960 = vst.msk [vmem:[#allocation9 + $0x8] sm:$0xff] %vm469_vm2, %v551_v25  ;;  %1121 = vmatprep.subr.bf16.mxu0 %v1299_v0 }
 0x231   :  { %v1175_v29 = vpop.eup %1174 }
 0x232   :  { %1106 = vmatmul.mubr.msk.bf16.vlgmr.msra.gmra.mxu1 %vm469_vm2, %v559_v26  ;;  %v552_v31 = vmul.f32 %v1175_v29, %v1405_v52  ;;  %v909_v52 = vsel %vm585_vm3, %v581_v48, 0 }
 0x233   :  { %1116 = vmatpush3.bf16.msra.mxu1 %v725_v27  ;;  %1117 = vmatprep.mubr.msk.bf16.mxu1 %vm1300_vm0, %v1299_v0 }
 0x234   :  { %v541_v32 = vpop.xlane.xlu1 %540  ;;  %v560_v34 = vpack.c.bf16 %v552_v31, %v552_v31  ;;  %961 = vst.msk [vmem:[#allocation9 + $0x10] sm:$0xff] %vm469_vm2, %v552_v31  ;;  %1127 = vmatprep.subr.bf16.mxu1 %v1299_v0 }
 0x235   :  { %1182 = vrcp.f32 %v541_v32  ;;  %v538_v33 = vpop.xlane.xlu0 %537  ;;  %v1177_v37 = vpop.eup %1176 }
 0x236   :  { %1184 = vrcp.f32 %v538_v33  ;;  %1112 = vmatmul.mubr.msk.bf16.vlgmr.msra.gmra.mxu0 %vm469_vm2, %v560_v34  ;;  %v553_v38 = vmul.f32 %v1177_v37, %v1409_v56 }
 0x237   :  { %1122 = vmatpush3.bf16.msra.mxu0 %v771_v35  ;;  %1123 = vmatprep.mubr.msk.bf16.mxu0 %vm1300_vm0, %v1299_v0 }
 0x238   :  { %v561_v40 = vpack.c.bf16 %v553_v38, %v553_v38  ;;  %962 = vst.msk [vmem:[#allocation9 + $0x18] sm:$0xff] %vm469_vm2, %v553_v38  ;;  %1133 = vmatprep.subr.bf16.mxu0 %v1299_v0 }
 0x23a   :  { %v1179_v42 = vpop.eup %1178  ;;  %1118 = vmatmul.mubr.msk.bf16.vlgmr.msra.gmra.mxu1 %vm469_vm2, %v561_v40 }
 0x23b   :  { %v1181_v46 = vpop.eup %1180  ;;  %v555_v44 = vmul.f32 %v1179_v42, %v1413_v58  ;;  %1128 = vmatpush3.bf16.msra.mxu1 %v817_v41  ;;  %1129 = vmatprep.mubr.msk.bf16.mxu1 %vm1300_vm0, %v1299_v0 }
 0x23c   :  { %v554_v47 = vmul.f32 %v1181_v46, %v1415_v59  ;;  %1139 = vmatprep.subr.bf16.mxu1 %v1299_v0 }
 0x23d   :  { %964 = vst.msk [vmem:[#allocation9 + $0x28] sm:$0xff] %vm469_vm2, %v555_v44  ;;  %v563_v51 = vpack.c.bf16 %v555_v44, %v555_v44 }
 0x23e   :  { %v562_v49 = vpack.c.bf16 %v554_v47, %v554_v47  ;;  %963 = vst.msk [vmem:[#allocation9 + $0x20] sm:$0xff] %vm469_vm2, %v554_v47 }
 0x240   :  { %1124 = vmatmul.mubr.msk.bf16.vlgmr.msra.gmra.mxu0 %vm469_vm2, %v562_v49 }
 0x241   :  { %1134 = vmatpush3.bf16.msra.mxu0 %v863_v50  ;;  %1135 = vmatprep.mubr.msk.bf16.mxu0 %vm1300_vm0, %v1299_v0 }
 0x242   :  { %v1183_v53 = vpop.eup %1182  ;;  %1130 = vmatmul.mubr.msk.bf16.vlgmr.msra.gmra.mxu1 %vm469_vm2, %v563_v51 }
 0x243   :  { %v1185_v54 = vpop.eup %1184  ;;  %v557_v55 = vmul.f32 %v1183_v53, %v1421_v62  ;;  %1140 = vmatpush3.bf16.msra.mxu1 %v909_v52  ;;  %1141 = vmatprep.mubr.msk.bf16.mxu1 %vm1300_vm0, %v1299_v0 }
 0x244   :  { %v556_v56 = vmul.f32 %v1185_v54, %v1423_v2 }
 0x245   :  { %966 = vst.msk [vmem:[#allocation9 + $0x38] sm:$0xff] %vm469_vm2, %v557_v55  ;;  %v565_v58 = vpack.c.bf16 %v557_v55, %v557_v55 }
 0x246   :  { %965 = vst.msk [vmem:[#allocation9 + $0x30] sm:$0xff] %vm469_vm2, %v556_v56  ;;  %v564_v57 = vpack.c.bf16 %v556_v56, %v556_v56 }
 0x248   :  { %1136 = vmatmul.mubr.msk.bf16.vlgmr.msra.gmra.mxu0 %vm469_vm2, %v564_v57 }
 0x24a   :  { %1142 = vmatmul.mubr.msk.bf16.vlgmr.msra.gmra.mxu1 %vm469_vm2, %v565_v58 }
 0x24b   :  { %1257 = shalt.err (!%p1254_p5)
}
 0x24c   :  { %990 = dma.vmem_to_hbm [thread:$0]  %s985_s2, 1024, %s1502_s4, [#allocation10], %s1296_s20, %s1296_s20, %s1297_s21  }
 0x24d   :  { %s1302_s4 = smov [#allocation8]  }
 0x24e   :  { %s972_s8 = sshll.u32 %s1302_s4, 4  ;;  %s973_s8 = int_to_ptr.vmem [resolvable:$true] %s972_s8 }
 0x24f   :  { %s1266_s9 = scalar_lea.vmem %s973_s8, 1024  ;;  %p1271_p7 = scmp.lt.s32.totalorder %s973_s8, %s973_s8 }
 0x250   :  { %p1267_p6 = scmp.ne.s32.totalorder %s973_s8, %s1266_s9  ;;  %p1272_p8 = scmp.lt.s32.totalorder %s1266_s9, %s1266_s9 }
 0x252   :  { %p1273_p9 = por %p1272_p8, %p1271_p7 }
 0x254   :  { %p1274_p10 = pnand %p1273_p9, %p1267_p6 }
 0x2ee   :  { %v623_v0 = vpop.f32.mrf.mxu0 }
 0x2ef   :  { %951 = vst.msk [vmem:[#allocation8] sm:$0xff] %vm92_vm1, %v623_v0 }
 0x2f0   :  { %v1101_v59 = vpop.f32.mrf.mxu0 }
 0x2f2   :  { %v626_v60 = vpop.f32.mrf.mxu0  ;;  %v669_v61 = vpop.f32.mrf.mxu1 }
 0x2f3   :  { %952 = vst.msk [vmem:[#allocation8 + $0x8] sm:$0xff] %vm92_vm1, %v669_v61 }
 0x2f4   :  { %v1102_v62 = vpop.f32.mrf.mxu0  ;;  %v1107_v63 = vpop.f32.mrf.mxu1 }
 0x2f6   :  { %v672_v1 = vpop.f32.mrf.mxu1  ;;  %v715_v2 = vpop.f32.mrf.mxu0 }
 0x2f7   :  { %953 = vst.msk [vmem:[#allocation8 + $0x10] sm:$0xff] %vm92_vm1, %v715_v2 }
 0x2f8   :  { %v1108_v3 = vpop.f32.mrf.mxu1  ;;  %v1113_v4 = vpop.f32.mrf.mxu0 }
 0x2fa   :  { %v718_v5 = vpop.f32.mrf.mxu0  ;;  %v761_v6 = vpop.f32.mrf.mxu1 }
 0x2fb   :  { %954 = vst.msk [vmem:[#allocation8 + $0x18] sm:$0xff] %vm92_vm1, %v761_v6 }
 0x2fc   :  { %v1114_v7 = vpop.f32.mrf.mxu0  ;;  %v1119_v8 = vpop.f32.mrf.mxu1 }
 0x2fe   :  { %v764_v9 = vpop.f32.mrf.mxu1 }
 0x300   :  { %v807_v10 = vpop.f32.mrf.mxu0  ;;  %v1120_v11 = vpop.f32.mrf.mxu1 }
 0x301   :  { %955 = vst.msk [vmem:[#allocation8 + $0x20] sm:$0xff] %vm92_vm1, %v807_v10 }
 0x302   :  { %v1125_v12 = vpop.f32.mrf.mxu0  ;;  %v853_v13 = vpop.f32.mrf.mxu1 }
 0x303   :  { %956 = vst.msk [vmem:[#allocation8 + $0x28] sm:$0xff] %vm92_vm1, %v853_v13 }
 0x304   :  { %v810_v14 = vpop.f32.mrf.mxu0  ;;  %v1131_v15 = vpop.f32.mrf.mxu1 }
 0x306   :  { %v1126_v16 = vpop.f32.mrf.mxu0  ;;  %v856_v17 = vpop.f32.mrf.mxu1 }
 0x308   :  { %v899_v18 = vpop.f32.mrf.mxu0  ;;  %v1132_v19 = vpop.f32.mrf.mxu1 }
 0x309   :  { %957 = vst.msk [vmem:[#allocation8 + $0x30] sm:$0xff] %vm92_vm1, %v899_v18 }
 0x30a   :  { %v1137_v20 = vpop.f32.mrf.mxu0  ;;  %v945_v21 = vpop.f32.mrf.mxu1 }
 0x30b   :  { %958 = vst.msk [vmem:[#allocation8 + $0x38] sm:$0xff] %vm92_vm1, %v945_v21 }
 0x30c   :  { %v902_v22 = vpop.f32.mrf.mxu0  ;;  %v1143_v23 = vpop.f32.mrf.mxu1 }
 0x30d   :  { %1277 = shalt.err (!%p1274_p10)
}
 0x30e   :  { %978 = dma.vmem_to_hbm [thread:$0]  %s973_s8, 1024, %s1501_s3, [#allocation4], %s1296_s20, %s1296_s20, %s1297_s21   ;;  %v1138_v24 = vpop.f32.mrf.mxu0  ;;  %v948_v25 = vpop.f32.mrf.mxu1 }
 0x310   :  { %v1144_v26 = vpop.f32.mrf.mxu1 }
 0x311   :  { %1290 = dma.done.wait [#allocation4], 1024  }
 0x312   :  { %1291 = vsyncadd [#allocation4], 4294966272 }
 0x313   :  { %1292 = dma.done.wait [#allocation10], 1024  }
 0x314   :  { %1293 = vsyncadd [#allocation10], 4294966272 }
 0x315   :  { %997 = vsyncpa [#allocation3], 1 }
 0x316   :  { %998 = vsyncpa [#allocation6], 1 }
 0x317   :  { %999 = vsyncpa [#allocation4], 1 }
 0x318   :  { %1000 = vsyncpa [#allocation10], 1 }

</bundles_post_ra>
